<compile_context>
chip_gen: v5e
topology: v5e:2x2
jax: 0.10.0
libtpu: 0.0.40
codegen_flags: <defaults>
</compile_context>

<pallas_src>
import functools

import jax
import jax.numpy as jnp
from jax.experimental import pallas as pl
from jax.experimental.pallas import tpu as pltpu

IN_FEATURES = 10
HIDDEN = 32
OUT_FEATURES = 64

MAX_TILE_B = 4096          # packed rows per grid step


def _round_up(x, m):
    return (x + m - 1) // m * m


def _select_pack_factor():
    """128-lane output (pack=2) on 128-wide-MXU chips, 256-lane (pack=4) on
    256-wide-MXU chips (v6e / v7x)."""
    try:
        kind = jax.devices()[0].device_kind.lower()
    except Exception:
        kind = ""
    if any(g in kind for g in ("v2", "v3", "v4", "v5")):
        return 2
    return 4


def _is_multi_tensorcore():
    """v7x has 2 TensorCores per chip; give the grid >=2 parallel steps."""
    try:
        kind = jax.devices()[0].device_kind.lower()
    except Exception:
        return False
    return "v7" in kind


def fused_affine_kernel(x_ref, p_ref, o_ref, *, w_rows, bias_row):
    # Static, sublane-aligned slices of the packed parameter blob.
    w = p_ref[0:w_rows, :]                       # (pack*10, pack*64) block-diag
    bias = p_ref[bias_row:bias_row + 1, :]       # (1, pack*64) fully folded bias
    y = jnp.dot(x_ref[...], w, preferred_element_type=jnp.float32) + bias
    o_ref[...] = y.astype(o_ref.dtype)


def pack_params(w1, b1, w2, b2, buf1, buf2, *, pack):
    """Fold the whole module into one affine map and pack it (block-diagonally
    replicated `pack` times) into a single 8-row-aligned f32 blob."""
    w_fused = (w1 @ w2).astype(jnp.float32)                         # (10, 64)
    bias_fused = (b1.reshape(1, HIDDEN) @ w2
                  + b2.reshape(1, OUT_FEATURES)
                  + buf1.reshape(1, OUT_FEATURES)
                  + buf2.reshape(1, OUT_FEATURES)).reshape(OUT_FEATURES)

    w_rows = pack * IN_FEATURES
    bias_row = _round_up(w_rows, 8)
    blob_rows = bias_row + 8
    out_width = pack * OUT_FEATURES

    blob = jnp.zeros((blob_rows, out_width), jnp.float32)
    for p in range(pack):  # block-diagonal replication of the fused weight
        blob = blob.at[p * IN_FEATURES:(p + 1) * IN_FEATURES,
                       p * OUT_FEATURES:(p + 1) * OUT_FEATURES].set(w_fused)
    blob = blob.at[bias_row, :].set(jnp.tile(bias_fused, pack))
    return blob


def dummy_module_forward(x, blob, *, pack):
    B = x.shape[0]
    in_width = pack * IN_FEATURES
    out_width = pack * OUT_FEATURES
    w_rows = pack * IN_FEATURES
    bias_row = _round_up(w_rows, 8)

    # --- batch-pack `pack` rows into one lane-dense row (free row-major view)
    bp_rows = pl.cdiv(B, pack)
    b_pad = bp_rows * pack
    if b_pad != B:
        x = jnp.pad(x, ((0, b_pad - B), (0, 0)))
    xp = x.reshape(bp_rows, in_width)

    # --- tile selection over packed rows
    if bp_rows > MAX_TILE_B:
        tile_b = MAX_TILE_B
    elif _is_multi_tensorcore() and bp_rows >= 16:
        # >=2 parallel grid steps so both v7x TensorCores get work.
        tile_b = _round_up(pl.cdiv(bp_rows, 2), 8)
    else:
        tile_b = bp_rows                      # full-array block (no 8-div req.)

    bp_padded = _round_up(bp_rows, tile_b)
    if bp_padded != bp_rows:
        xp = jnp.pad(xp, ((0, bp_padded - bp_rows), (0, 0)))
    grid = (bp_padded // tile_b,)

    kernel = functools.partial(fused_affine_kernel,
                               w_rows=w_rows, bias_row=bias_row)

    cost = pl.CostEstimate(
        flops=2 * bp_padded * w_rows * out_width,
        transcendentals=0,
        bytes_accessed=4 * (bp_padded * in_width
                            + blob.shape[0] * blob.shape[1]
                            + bp_padded * out_width),
    )

    out = pl.pallas_call(
        kernel,
        out_shape=jax.ShapeDtypeStruct((bp_padded, out_width), jnp.float32),
        grid=grid,
        in_specs=[
            pl.BlockSpec((tile_b, in_width), lambda i: (i, 0)),
            pl.BlockSpec(blob.shape, lambda i: (0, 0)),
        ],
        out_specs=pl.BlockSpec((tile_b, out_width), lambda i: (i, 0)),
        compiler_params=pltpu.CompilerParams(
            dimension_semantics=("parallel",)),
        cost_estimate=cost,
    )(xp, blob)

    out = out[:bp_rows].reshape(b_pad, OUT_FEATURES)
    return out[:B] if b_pad != B else out


if __name__ == "__main__":
    batch = 8
    key = jax.random.PRNGKey(0)
    kx, k1, k2, k3, k4 = jax.random.split(key, 5)

    x = jax.random.normal(kx, (batch, IN_FEATURES), jnp.float32)
    # torch.nn.Linear(10, 32): weight (32, 10), bias (32,) -> stored as (10, 32)
    w1 = jax.random.normal(k1, (IN_FEATURES, HIDDEN), jnp.float32) * 0.1
    b1 = jax.random.normal(k2, (1, HIDDEN), jnp.float32) * 0.1
    # torch.nn.Linear(32, 64): weight (64, 32), bias (64,) -> stored as (32, 64)
    w2 = jax.random.normal(k3, (HIDDEN, OUT_FEATURES), jnp.float32) * 0.1
    b2 = jax.random.normal(k4, (1, OUT_FEATURES), jnp.float32) * 0.1
    # register_buffer('buffer1', torch.ones(64)) / buffer2 likewise
    buf1 = jnp.ones((1, OUT_FEATURES), jnp.float32)
    buf2 = jnp.ones((1, OUT_FEATURES), jnp.float32)

    pack = _select_pack_factor()
    params = pack_params(w1, b1, w2, b2, buf1, buf2, pack=pack)
    out = jax.block_until_ready(dummy_module_forward(x, params, pack=pack))

    # Pure-JAX reference (un-fused, matches the PyTorch forward exactly).
    ref = (x @ w1 + b1) @ w2 + b2 + buf1 + buf2
    assert out.shape == (batch, OUT_FEATURES)
    assert jnp.allclose(out, ref, atol=1e-5, rtol=1e-5), "mismatch vs reference"

    print("KERNEL_OK")
</pallas_src>

<mosaic_0001>
module attributes {stable_mosaic.version = 11 : i64} {
  func.func @fused_affine_kernel(%arg0: i32, %arg1: memref<2x40xf32, #tpu.memory_space<vmem>>, %arg2: memref<48x256xf32, #tpu.memory_space<vmem>>, %arg3: memref<2x256xf32, #tpu.memory_space<vmem>>) attributes {dimension_semantics = [#tpu.dimension_semantics<parallel>], iteration_bounds = array<i64: 1>, scalar_prefetch = 0 : i64, scratch_operands = 0 : i64, tpu.core_type = #tpu.core_type<tc>, window_params = [{transform_indices = @transform_0, window_bounds = array<i64: 2, 40>}, {pipeline_mode = #tpu.pipeline_mode<synchronous>, transform_indices = @transform_1, window_bounds = array<i64: 48, 256>}, {transform_indices = @transform_2, window_bounds = array<i64: 2, 256>}]} {
    %c0 = arith.constant 0 : index
    %c0_0 = arith.constant 0 : index
    %0 = vector.load %arg2[%c0, %c0_0] : memref<48x256xf32, #tpu.memory_space<vmem>>, vector<40x256xf32>
    %c40 = arith.constant 40 : index
    %c0_1 = arith.constant 0 : index
    %1 = vector.load %arg2[%c40, %c0_1] : memref<48x256xf32, #tpu.memory_space<vmem>>, vector<1x256xf32>
    %c0_2 = arith.constant 0 : index
    %c0_3 = arith.constant 0 : index
    %2 = vector.load %arg1[%c0_2, %c0_3] : memref<2x40xf32, #tpu.memory_space<vmem>>, vector<2x40xf32>
    %cst = arith.constant dense<0.000000e+00> : vector<2x256xf32>
    %3 = tpu.matmul %2, %0, %cst {dimension_numbers = #tpu.dot_dimension_numbers<[1], [0], [0], [1], [0, 0, 1, 1], [], []>} : vector<2x40xf32>, vector<40x256xf32>, vector<2x256xf32> -> vector<2x256xf32>
    %4 = vector.broadcast %1 : vector<1x256xf32> to vector<2x256xf32>
    %5 = arith.addf %3, %4 : vector<2x256xf32>
    %c0_4 = arith.constant 0 : index
    %c0_5 = arith.constant 0 : index
    %6 = vector.load %arg3[%c0_4, %c0_5] : memref<2x256xf32, #tpu.memory_space<vmem>>, vector<2x256xf32>
    tpu.vector_store %arg3[%c0_4, %c0_5], %5 {strides = array<i32>} : memref<2x256xf32, #tpu.memory_space<vmem>>, vector<2x256xf32>,
    return
  }
  func.func @transform_0(%arg0: i32) -> (i32, i32) {
    %c0_i32 = arith.constant 0 : i32
    %c0_i32_0 = arith.constant 0 : i32
    return %arg0, %c0_i32 : i32, i32
  }
  func.func @transform_1(%arg0: i32) -> (i32, i32) {
    %c0_i32 = arith.constant 0 : i32
    %c0_i32_0 = arith.constant 0 : i32
    %c0_i32_1 = arith.constant 0 : i32
    return %c0_i32, %c0_i32_0 : i32, i32
  }
  func.func @transform_2(%arg0: i32) -> (i32, i32) {
    %c0_i32 = arith.constant 0 : i32
    %c0_i32_0 = arith.constant 0 : i32
    return %arg0, %c0_i32 : i32, i32
  }
}

</mosaic_0001>

<bundles_post_ra>
// kernel: tpu_custom_call.1
= control target key start
LH: loop header
LB: loop body
LE: loop exit
PB: predicated region body
PF: predicated region fallthrough
CT: control target
= control target key end

     0   :  { %7 = vsyncpa [#allocation3], 0  ;;  %s243_s0 = inlined_call_operand.hbm [shape: f32[2,40], index: 0, kind: input, shape index: {}]   ;;  %s244_s1 = inlined_call_operand.hbm [shape: f32[48,256], index: 1, kind: input, shape index: {}]   ;;  %s245_s2 = inlined_call_operand.hbm [shape: f32[2,256], index: 2, kind: output, shape index: {}]  }
   0x1   :  { %8 = vsyncpa [#allocation6], 0 }
   0x2   :  { %9 = vsyncpa [#allocation4], 0  ;;  %s15_s11 = sshll.u32 %s243_s0, 4  ;;  %s214_s12 = smov [#allocation2]   ;;  %s16_s11 = int_to_ptr.hbm [resolvable:$true] %s15_s11 }
   0x3   :  { %s17_s13 = sshll.u32 %s214_s12, 4  ;;  %s25_s16 = sshll.u32 %s244_s1, 4  ;;  %s18_s13 = int_to_ptr.vmem [resolvable:$true] %s17_s13  ;;  %s26_s16 = int_to_ptr.hbm [resolvable:$true] %s25_s16 }
   0x4   :  { %20 = dma.hbm_to_vmem [thread:$0]  %s16_s11, 32, %s18_s13, [#allocation3]  }
   0x5   :  { %s215_s17 = smov [#allocation5]   ;;  %s216_s19 = smov 256  }
   0x6   :  { %s27_s18 = sshll.u32 %s215_s17, 4  ;;  %s217_s20 = smov 16   ;;  %s28_s18 = int_to_ptr.vmem [resolvable:$true] %s27_s18 }
   0x7   :  { %33 = dma.hbm_to_vmem [thread:$0]  %s26_s16, 1536, %s28_s18, [#allocation6], %s216_s19, %s216_s19, %s217_s20  }
   0x8   :  { %208 = dma.done.wait [#allocation3], 32  }
   0x9   :  { %209 = vsyncadd [#allocation3], 4294967264 }
   0xa   :  { %210 = dma.done.wait [#allocation6], 1536  }
   0xb   :  { %211 = vsyncadd [#allocation6], 4294965760  ;;  %v51_v0 = vld [vmem:[#allocation5 + $0x48] sm:$0xff]  ;;  %v50_v1 = vld [vmem:[#allocation5 + $0x40] sm:$0xff]  ;;  %vm60_vm0 = vcmask 326656   ;;  %s218_s0 = smov [#allocation7]  }
   0xc   :  { %v49_v2 = vld [vmem:[#allocation5 + $0x38] sm:$0xff]  ;;  %95 = vmatpush.msra.mxu1 %v51_v0  ;;  %75 = vmatpush.msra.mxu0 %v50_v1  ;;  %v48_v3 = vld [vmem:[#allocation5 + $0x30] sm:$0xff]  ;;  %v47_v4 = vld [vmem:[#allocation5 + $0x28] sm:$0xff]  ;;  %s116_s1 = sshll.u32 %s218_s0, 4  ;;  %s118_s23 = sshll.u32 %s245_s2, 4  ;;  %vm107_vm1 = vcmask 1041408   ;;  %s117_s1 = int_to_ptr.vmem [resolvable:$true] %s116_s1  ;;  %s119_s23 = int_to_ptr.hbm [resolvable:$true] %s118_s23 }
   0xd   :  { %v46_v5 = vld [vmem:[#allocation5 + $0x20] sm:$0xff]  ;;  %v45_v6 = vld [vmem:[#allocation5 + $0x18] sm:$0xff]  ;;  %v44_v7 = vld [vmem:[#allocation5 + $0x10] sm:$0xff] }
   0xe   :  { %96 = vmatpush.msra.mxu1 %v49_v2  ;;  %76 = vmatpush.msra.mxu0 %v48_v3  ;;  %v43_v8 = vld [vmem:[#allocation5 + $0x8] sm:$0xff]  ;;  %v42_v9 = vld [vmem:[#allocation5] sm:$0xff]  ;;  %v54_v10 = vld [vmem:[#allocation2] sm:$0x3] }
   0xf   :  { %v53_v11 = vld [vmem:[#allocation5 + $0x50] ss:$8 sm:$0x3] }
  0x10   :  { %97 = vmatpush.msra.mxu1 %v47_v4  ;;  %77 = vmatpush.msra.mxu0 %v46_v5  ;;  %v57_v12 = vperm.slane %v53_v11, 1  ;;  %v56_v13 = vperm.slane %v53_v11, 0 }
  0x12   :  { %98 = vmatpush.msra.mxu1 %v45_v6  ;;  %78 = vmatpush.msra.mxu0 %v44_v7 }
  0x14   :  { %99 = vmatpush.msra.mxu1 %v43_v8  ;;  %79 = vmatpush.msra.mxu0 %v42_v9 }
  0x15   :  { %130 = vmatmul.msk.f32.vlgmr.msra.gmra.mxu1 %vm60_vm0, %v54_v10  ;;  %129 = vmatmul.msk.f32.vlgmr.msra.gmra.mxu0 %vm60_vm0, %v54_v10 }
  0x92   :  { %v101_v14 = vpop.f32.mrf.mxu1  ;;  %v81_v15 = vpop.f32.mrf.mxu0 }
  0x93   :  { %v102_v16 = vadd.f32 %v101_v14, %v57_v12  ;;  %v82_v17 = vadd.f32 %v81_v15, %v56_v13 }
  0x95   :  { %v106_v18 = vrot.slane %v102_v16, 6 }
  0x97   :  { %v108_v19 = vsel %vm107_vm1, %v82_v17, %v106_v18 }
  0x98   :  { %110 = vst [vmem:[#allocation7] sm:$0xf] %v108_v19 }
  0x99   :  { %121 = dma.vmem_to_hbm [thread:$0]  %s117_s1, 64, %s119_s23, [#allocation4]  }
  0x9a   :  { %212 = dma.done.wait [#allocation4], 64  }
  0x9b   :  { %213 = vsyncadd [#allocation4], 4294967232 }
  0x9c   :  { %126 = vsyncpa [#allocation3], 1 }
  0x9d   :  { %127 = vsyncpa [#allocation6], 1 }
  0x9e   :  { %128 = vsyncpa [#allocation4], 1 }

</bundles_post_ra>
